<compile_context>
chip_gen: v7x
topology: tpu7x:2x2x1
jax: 0.10.0
libtpu: 0.0.40
codegen_flags: <defaults>
</compile_context>

<pallas_src>
import functools

import jax
import jax.numpy as jnp
from jax.experimental import pallas as pl
from jax.experimental.pallas import tpu as pltpu


def _cdiv(a, b):
    return (a + b - 1) // b


def _contrastive_loss_kernel(margin, eps, n_valid, tb, blocks_per_core,
                             may_mask, o1_ref, o2_ref, lbl_ref, out_ref):
    """Grid point (p, i): accumulate the loss-sum of one row tile into the
    per-core partial accumulator out_ref (shape (1, 1, 1))."""
    p = pl.program_id(0)          # parallel axis (per-core partial sum)
    i = pl.program_id(1)          # reduction axis over this core's row blocks

    @pl.when(i == 0)
    def _init():
        out_ref[...] = jnp.zeros_like(out_ref)

    # Stream native-dtype tiles, widen in-kernel.
    o1 = o1_ref[...].astype(jnp.float32)                         # (TB, D)
    o2 = o2_ref[...].astype(jnp.float32)
    diff = o1 - o2 + eps          # eps added per element, as F.pairwise_distance
    sq_dist = jnp.sum(diff * diff, axis=1, keepdims=True)        # (TB, 1) = dist^2
    dist = jnp.sqrt(sq_dist)                                      # (TB, 1)

    lbl = lbl_ref[...].astype(jnp.float32)                        # (TB, 1)
    hinge = jnp.maximum(margin - dist, 0.0)                       # clamp(min=0)
    per_row = (1.0 - lbl) * sq_dist + lbl * (hinge * hinge)       # (TB, 1)

    # Unclamped global start row of this tile (DMA index_map may clamp the
    # block; rows at/after the real batch size are masked out here).
    row0 = (p * blocks_per_core + i) * tb

    if may_mask:
        tile_may_overrun = row0 + tb > n_valid

        @pl.when(jnp.logical_not(tile_may_overrun))
        def _full_tile():
            out_ref[...] += jnp.sum(per_row, keepdims=True)[None]

        @pl.when(tile_may_overrun)
        def _partial_tile():
            row = row0 + jax.lax.broadcasted_iota(jnp.int32, per_row.shape, 0)
            masked = jnp.where(row < n_valid, per_row, 0.0)   # select, not mult
            out_ref[...] += jnp.sum(masked, keepdims=True)[None]
    else:
        out_ref[...] += jnp.sum(per_row, keepdims=True)[None]


def contrastive_loss(output1, output2, label, *, margin=1.0, eps=1e-6,
                     target_tile_bytes=2 << 20, max_block_rows=4096):
    """output1/output2: (B, D); label: (B, 1). Returns the scalar loss (f32)."""
    B, D = output1.shape
    assert output2.shape == (B, D) and label.shape == (B, 1)

    itemsize = max(jnp.dtype(output1.dtype).itemsize,
                   jnp.dtype(output2.dtype).itemsize)

    # --- Row-tile size from a VMEM byte budget (sublane-aligned).
    row_bytes = max(1, D * itemsize)
    tb = (target_tile_bytes // row_bytes) // 8 * 8
    tb = int(max(8, min(tb, max_block_rows)))
    if tb >= B:
        tb = B                     # single block == full array dim (always legal)
    n_blocks = _cdiv(B, tb)

    # --- 2-way parallel axis (per-core partial sums) when there is enough work.
    n_cores = 2 if n_blocks >= 2 else 1
    blocks_per_core = _cdiv(n_blocks, n_cores)
    oversubscribed = n_cores * blocks_per_core > n_blocks
    may_mask = (B % tb != 0) or oversubscribed
    last_block = n_blocks - 1

    if oversubscribed:
        def data_map(p, i):
            return (jnp.minimum(p * blocks_per_core + i, last_block), 0)
    else:
        def data_map(p, i):
            return (p * blocks_per_core + i, 0)

    # 2 streamed inputs x 2 pipeline buffers + lane-padded label tiles + slack.
    tile_bytes = tb * D * itemsize
    approx_vmem = 4 * tile_bytes + 2 * tb * 128 * jnp.dtype(label.dtype).itemsize
    vmem_limit = int(min(48 << 20, max(32 << 20, 2 * approx_vmem)))

    kernel = functools.partial(_contrastive_loss_kernel, float(margin),
                               float(eps), B, tb, blocks_per_core, may_mask)

    partials = pl.pallas_call(
        kernel,
        out_shape=jax.ShapeDtypeStruct((n_cores, 1, 1), jnp.float32),
        grid=(n_cores, blocks_per_core),
        in_specs=[
            pl.BlockSpec((tb, D), data_map),       # output1 tile
            pl.BlockSpec((tb, D), data_map),       # output2 tile
            pl.BlockSpec((tb, 1), data_map),       # label tile
        ],
        # Per-core resident (1,1,1) accumulator: block index depends only on p.
        out_specs=pl.BlockSpec((1, 1, 1), lambda p, i: (p, 0, 0)),
        compiler_params=pltpu.CompilerParams(
            dimension_semantics=("parallel", "arbitrary"),
            vmem_limit_bytes=vmem_limit),
    )(output1, output2, label)

    return jnp.sum(partials) / B


def contrastive_loss_ref(output1, output2, label, margin=1.0, eps=1e-6):
    """Pure-JAX reference matching the PyTorch module."""
    o1 = output1.astype(jnp.float32)
    o2 = output2.astype(jnp.float32)
    lbl = label.astype(jnp.float32)
    dist = jnp.sqrt(jnp.sum((o1 - o2 + eps) ** 2, axis=1, keepdims=True))
    return jnp.mean((1.0 - lbl) * dist ** 2
                    + lbl * jnp.maximum(margin - dist, 0.0) ** 2)


if __name__ == "__main__":
    key = jax.random.PRNGKey(0)
    k1, k2, k3 = jax.random.split(key, 3)

    # Small "embedding pair" shapes consistent with the module's forward.
    B, D = 8, 32
    o1 = jax.random.normal(k1, (B, D), jnp.float32)
    o2 = jax.random.normal(k2, (B, D), jnp.float32)
    lbl = jax.random.bernoulli(k3, 0.5, (B, 1)).astype(jnp.float32)

    loss = contrastive_loss(o1, o2, lbl, margin=1.0)
    jax.block_until_ready(loss)
    ref = contrastive_loss_ref(o1, o2, lbl, margin=1.0)
    assert loss.shape == () and loss.dtype == jnp.float32
    assert jnp.allclose(loss, ref, rtol=1e-5, atol=1e-5), (loss, ref)

    # Exercise the multi-block path: partial last tile, 2-way parallel axis,
    # and (for rows=72) the oversubscribed/clamped block index path.
    B2, D2 = 200, 32
    kk1, kk2, kk3 = jax.random.split(jax.random.PRNGKey(1), 3)
    q1 = jax.random.normal(kk1, (B2, D2), jnp.float32)
    q2 = jax.random.normal(kk2, (B2, D2), jnp.float32)
    lbl2 = jax.random.bernoulli(kk3, 0.5, (B2, 1)).astype(jnp.float32)
    ref2 = contrastive_loss_ref(q1, q2, lbl2, margin=1.0)
    for rows in (64, 72):
        loss2 = contrastive_loss(q1, q2, lbl2, margin=1.0, max_block_rows=rows)
        jax.block_until_ready(loss2)
        assert jnp.allclose(loss2, ref2, rtol=1e-5, atol=1e-5), (rows, loss2, ref2)

    print("KERNEL_OK")
</pallas_src>

<mosaic_0001>
module attributes {stable_mosaic.version = 11 : i64} {
  func.func @_contrastive_loss_kernel(%arg0: i32, %arg1: i32, %arg2: memref<8x32xf32, #tpu.memory_space<vmem>>, %arg3: memref<8x32xf32, #tpu.memory_space<vmem>>, %arg4: memref<8x1xf32, #tpu.memory_space<vmem>>, %arg5: memref<1x1x1xf32, #tpu.memory_space<vmem>>) attributes {dimension_semantics = [#tpu.dimension_semantics<parallel>, #tpu.dimension_semantics<arbitrary>], iteration_bounds = array<i64: 1, 1>, scalar_prefetch = 0 : i64, scratch_operands = 0 : i64, tpu.core_type = #tpu.core_type<tc>, window_params = [{transform_indices = @transform_0, window_bounds = array<i64: 8, 32>}, {transform_indices = @transform_1, window_bounds = array<i64: 8, 32>}, {transform_indices = @transform_2, window_bounds = array<i64: 8, 1>}, {transform_indices = @transform_3, window_bounds = array<i64: 1, 1, 1>}]} {
    %c0_i32 = arith.constant 0 : i32
    %0 = arith.cmpi eq, %arg1, %c0_i32 : i32
    %1 = arith.extui %0 : i1 to i32
    %c0_i32_0 = arith.constant 0 : i32
    %2 = arith.cmpi ne, %1, %c0_i32_0 : i32
    scf.if %2 {
      %cst_17 = arith.constant 0.000000e+00 : f32
      %32 = vector.broadcast %cst_17 : f32 to vector<1x1x1xf32>
      %c0_18 = arith.constant 0 : index
      %c0_19 = arith.constant 0 : index
      %c0_20 = arith.constant 0 : index
      %33 = vector.load %arg5[%c0_18, %c0_19, %c0_20] : memref<1x1x1xf32, #tpu.memory_space<vmem>>, vector<1x1x1xf32>
      tpu.vector_store %arg5[%c0_18, %c0_19, %c0_20], %32 {strides = array<i32>} : memref<1x1x1xf32, #tpu.memory_space<vmem>>, vector<1x1x1xf32>,
    } else {
    }
    %c0 = arith.constant 0 : index
    %c0_1 = arith.constant 0 : index
    %3 = vector.load %arg2[%c0, %c0_1] : memref<8x32xf32, #tpu.memory_space<vmem>>, vector<8x32xf32>
    %c0_2 = arith.constant 0 : index
    %c0_3 = arith.constant 0 : index
    %4 = vector.load %arg3[%c0_2, %c0_3] : memref<8x32xf32, #tpu.memory_space<vmem>>, vector<8x32xf32>
    %5 = arith.subf %3, %4 : vector<8x32xf32>
    %cst = arith.constant 9.99999997E-7 : f32
    %6 = vector.broadcast %cst : f32 to vector<8x32xf32>
    %7 = arith.addf %5, %6 : vector<8x32xf32>
    %8 = arith.mulf %7, %7 : vector<8x32xf32>
    %cst_4 = arith.constant dense<0.000000e+00> : vector<8xf32>
    %9 = vector.multi_reduction <add>, %8, %cst_4 [1] : vector<8x32xf32> to vector<8xf32>
    %10 = vector.shape_cast %9 : vector<8xf32> to vector<8x1xf32>
    %11 = math.sqrt %10 : vector<8x1xf32>
    %c0_5 = arith.constant 0 : index
    %c0_6 = arith.constant 0 : index
    %12 = vector.load %arg4[%c0_5, %c0_6] : memref<8x1xf32, #tpu.memory_space<vmem>>, vector<8x1xf32>
    %cst_7 = arith.constant 1.000000e+00 : f32
    %13 = vector.broadcast %cst_7 : f32 to vector<8x1xf32>
    %14 = arith.subf %13, %11 : vector<8x1xf32>
    %cst_8 = arith.constant 0.000000e+00 : f32
    %15 = vector.broadcast %cst_8 : f32 to vector<8x1xf32>
    %16 = arith.maximumf %14, %15 : vector<8x1xf32>
    %cst_9 = arith.constant 1.000000e+00 : f32
    %17 = vector.broadcast %cst_9 : f32 to vector<8x1xf32>
    %18 = arith.subf %17, %12 : vector<8x1xf32>
    %19 = arith.mulf %18, %10 : vector<8x1xf32>
    %20 = arith.mulf %16, %16 : vector<8x1xf32>
    %21 = arith.mulf %12, %20 : vector<8x1xf32>
    %22 = arith.addf %19, %21 : vector<8x1xf32>
    %c0_10 = arith.constant 0 : index
    %c0_11 = arith.constant 0 : index
    %c0_12 = arith.constant 0 : index
    %23 = vector.load %arg5[%c0_10, %c0_11, %c0_12] : memref<1x1x1xf32, #tpu.memory_space<vmem>>, vector<1x1x1xf32>
    %24 = vector.shape_cast %22 : vector<8x1xf32> to vector<1x8x1xf32>
    %cst_13 = arith.constant dense<0.000000e+00> : vector<1xf32>
    %25 = vector.multi_reduction <add>, %24, %cst_13 [1, 2] : vector<1x8x1xf32> to vector<1xf32>
    %26 = vector.shape_cast %25 : vector<1xf32> to vector<1x1x1xf32>
    %27 = vector.extract %26[0, 0, 0] : f32 from vector<1x1x1xf32>
    %28 = vector.broadcast %27 : f32 to vector<1x1xf32>
    %29 = vector.shape_cast %28 : vector<1x1xf32> to vector<1x1x1xf32>
    %30 = arith.addf %23, %29 : vector<1x1x1xf32>
    %c0_14 = arith.constant 0 : index
    %c0_15 = arith.constant 0 : index
    %c0_16 = arith.constant 0 : index
    %31 = vector.load %arg5[%c0_14, %c0_15, %c0_16] : memref<1x1x1xf32, #tpu.memory_space<vmem>>, vector<1x1x1xf32>
    tpu.vector_store %arg5[%c0_14, %c0_15, %c0_16], %30 {strides = array<i32>} : memref<1x1x1xf32, #tpu.memory_space<vmem>>, vector<1x1x1xf32>,
    return
  }
  func.func @transform_0(%arg0: i32, %arg1: i32) -> (i32, i32) {
    %c1_i32 = arith.constant 1 : i32
    %0 = arith.muli %arg0, %c1_i32 : i32
    %1 = arith.addi %0, %arg1 : i32
    %c0_i32 = arith.constant 0 : i32
    %c0_i32_0 = arith.constant 0 : i32
    return %1, %c0_i32 : i32, i32
  }
  func.func @transform_1(%arg0: i32, %arg1: i32) -> (i32, i32) {
    %c1_i32 = arith.constant 1 : i32
    %0 = arith.muli %arg0, %c1_i32 : i32
    %1 = arith.addi %0, %arg1 : i32
    %c0_i32 = arith.constant 0 : i32
    %c0_i32_0 = arith.constant 0 : i32
    return %1, %c0_i32 : i32, i32
  }
  func.func @transform_2(%arg0: i32, %arg1: i32) -> (i32, i32) {
    %c1_i32 = arith.constant 1 : i32
    %0 = arith.muli %arg0, %c1_i32 : i32
    %1 = arith.addi %0, %arg1 : i32
    %c0_i32 = arith.constant 0 : i32
    %c0_i32_0 = arith.constant 0 : i32
    return %1, %c0_i32 : i32, i32
  }
  func.func @transform_3(%arg0: i32, %arg1: i32) -> (i32, i32, i32) {
    %c0_i32 = arith.constant 0 : i32
    %c0_i32_0 = arith.constant 0 : i32
    %c0_i32_1 = arith.constant 0 : i32
    return %arg0, %c0_i32, %c0_i32_0 : i32, i32, i32
  }
}

</mosaic_0001>

<bundles_post_ra>
// kernel: tpu_custom_call.1
= control target key start
LH: loop header
LB: loop body
LE: loop exit
PB: predicated region body
PF: predicated region fallthrough
CT: control target
= control target key end

     0   :  { %8 = vsyncpa [#allocation3], 0  ;;  %s248_s0 = inlined_call_operand.vmem [shape: f32[8,32], index: 0, kind: input, shape index: {}]   ;;  %s249_s1 = inlined_call_operand.hbm [shape: f32[8,32], index: 1, kind: input, shape index: {}]   ;;  %s250_s2 = inlined_call_operand.vmem [shape: f32[8,1], index: 2, kind: input, shape index: {}]   ;;  %s251_s3 = inlined_call_operand.hbm [shape: f32[1,1,1], index: 3, kind: output, shape index: {}]  }
   0x1   :  { %9 = vsyncpa [#allocation4], 0  ;;  %s193_s12 = smov [#allocation2]   ;;  %s145_s16 = scalar_lea.hbm %s249_s1, 128 }
   0x2   :  { %s27_s13 = sshll.u32 %s193_s12, 4  ;;  %p146_p0 = scmp.ne.s32.totalorder %s249_s1, %s145_s16  ;;  %s28_s13 = int_to_ptr.vmem [resolvable:$true] %s27_s13 }
   0x3   :  { %p149_p1 = scmp.lt.u32.totalorder %s145_s16, %s249_s1 }
   0x5   :  { %p151_p2 = pnand %p149_p1, %p146_p0 }
   0x7   :  { %154 = shalt.err (!%p151_p2)
}
   0x8   :  { %s155_s21 = scalar_lea.vmem %s28_s13, 128  ;;  %p160_p4 = scmp.lt.s32.totalorder %s28_s13, %s28_s13 }
   0x9   :  { %p156_p3 = scmp.ne.s32.totalorder %s28_s13, %s155_s21  ;;  %p161_p5 = scmp.lt.s32.totalorder %s155_s21, %s155_s21 }
   0xb   :  { %p162_p6 = por %p161_p5, %p160_p4 }
   0xd   :  { %p163_p7 = pnand %p162_p6, %p156_p3 }
   0xf   :  { %166 = shalt.err (!%p163_p7)
}
  0x10   :  { %30 = dma.hbm_to_vmem [thread:$0]  %s249_s1, 128, %s28_s13, [#allocation3]  }
  0x11   :  { %189 = dma.done.wait [#allocation3], 128  }
  0x12   :  { %190 = vsyncadd [#allocation3], 4294967168  ;;  %vm69_vm0 = vcmask 0   ;;  %v194_v0 = vmov 0.0   ;;  %v71_v1 = vld [vmem:[%s248_s0] sm:$0xff]  ;;  %vm76_vm1 = vcmask 261120  }
  0x13   :  { %70 = vst.msk [vmem:[#allocation5] sm:$0x1] %vm69_vm0, %v194_v0  ;;  %v72_v2 = vld [vmem:[#allocation2] sm:$0xff]  ;;  %vm96_vm4 = vcmask 7168   ;;  %s195_s0 = smov [#allocation5]  }
  0x14   :  { %v73_v3 = vsub.f32 %v71_v1, %v72_v2  ;;  %v87_v13 = vld [vmem:[%s250_s2] sm:$0xff]  ;;  %s117_s2 = sshll.u32 %s195_s0, 4  ;;  %s118_s2 = int_to_ptr.vmem [resolvable:$true] %s117_s2 }
  0x15   :  { %v90_v16 = vsub.f32 1.0, %v87_v13  ;;  %s167_s28 = scalar_lea.vmem %s118_s2, 16  ;;  %s171_s29 = scalar_lea.vmem %s118_s2, 32 }
  0x16   :  { %v74_v4 = vadd.f32 1e-06, %v73_v3  ;;  %p168_p8 = scmp.ne.s32.totalorder %s118_s2, %s167_s28  ;;  %p172_p9 = scmp.lt.s32.totalorder %s118_s2, %s118_s2 }
  0x17   :  { %p173_p10 = scmp.lt.s32.totalorder %s171_s29, %s167_s28 }
  0x18   :  { %v75_v5 = vmul.f32 %v74_v4, %v74_v4 }
  0x19   :  { %p174_p11 = por %p173_p10, %p172_p9 }
  0x1a   :  { %v77_v6 = vsel %vm76_vm1, %v75_v5, 0.0  ;;  %v95_v29 = vld [vmem:[#allocation5] sm:$0x1] }
  0x1b   :  { %78 = vadd.xlane.f32.xlu0 %v77_v6  ;;  %p175_p12 = pnand %p174_p11, %p168_p8 }
  0xa8   :  { %v79_v7 = vpop.xlane.xlu0 %78 }
  0xa9   :  { %143 = vrsqrt.f32 %v79_v7  ;;  %vm82_vm2 = vcmp.eq.f32.partialorder %v79_v7, inf  ;;  %v85_v10 = vand.u32 2147483648, %v79_v7  ;;  %vm84_vm3 = vcmp.eq.f32.partialorder %v79_v7, 0.0 }
  0xaa   :  { %v91_v18 = vmul.f32 %v90_v16, %v79_v7 }
  0xb3   :  { %v144_v8 = vpop.eup %143 }
  0xb4   :  { %v81_v9 = vmul.f32 %v144_v8, %v79_v7 }
  0xb6   :  { %v83_v11 = vsel %vm82_vm2, %v79_v7, %v81_v9 }
  0xb7   :  { %v86_v12 = vsel %vm84_vm3, %v85_v10, %v83_v11 }
  0xb8   :  { %v88_v14 = vsub.f32 1.0, %v86_v12 }
  0xba   :  { %v89_v15 = vmax.f32 %v88_v14, 0.0 }
  0xbc   :  { %v92_v17 = vmul.f32 %v89_v15, %v89_v15 }
  0xbe   :  { %v93_v19 = vmul.f32 %v92_v17, %v87_v13 }
  0xc0   :  { %v94_v20 = vadd.f32 %v93_v19, %v91_v18 }
  0xc2   :  { %v97_v21 = vsel %vm96_vm4, %v94_v20, 0.0 }
  0xc3   :  { %98 = vadd.xlane.f32.xlu0 %v97_v21 }
 0x150   :  { %v99_v22 = vpop.xlane.xlu0 %98 }
 0x151   :  { %v100_v23 = vrot.slane %v99_v22, 4 }
 0x153   :  { %v101_v24 = vadd.f32 %v100_v23, %v99_v22 }
 0x155   :  { %v102_v25 = vrot.slane %v101_v24, 2 }
 0x157   :  { %v103_v26 = vadd.f32 %v102_v25, %v101_v24 }
 0x159   :  { %v104_v27 = vrot.slane %v103_v26, 1 }
 0x15b   :  { %v105_v28 = vadd.f32 %v104_v27, %v103_v26 }
 0x15d   :  { %138 = vpush %v105_v28 }
 0x18e   :  { %s139_s27 = spop %138 }
 0x18f   :  { %v107_v30 = vstv %s139_s27 }
 0x190   :  { %v108_v31 = vadd.f32 %v107_v30, %v95_v29 }
 0x192   :  { %110 = vst.msk [vmem:[#allocation5] sm:$0x1] %vm69_vm0, %v108_v31 }
 0x193   :  { %178 = shalt.err (!%p175_p12)
}
 0x194   :  { %s179_s5 = scalar_lea.hbm %s251_s3, 16 }
 0x195   :  { %p180_p13 = scmp.ne.s32.totalorder %s251_s3, %s179_s5  ;;  %p183_p0 = scmp.lt.u32.totalorder %s179_s5, %s251_s3 }
 0x197   :  { %p185_p1 = pnand %p183_p0, %p180_p13 }
 0x199   :  { %188 = shalt.err (!%p185_p1)
}
 0x19a   :  { %120 = dma.vmem_to_hbm [thread:$0]  %s118_s2, 16, %s251_s3, [#allocation4]  }
 0x19b   :  { %191 = dma.done.wait [#allocation4], 16  }
 0x19c   :  { %192 = vsyncadd [#allocation4], 4294967280 }
 0x19d   :  { %124 = vsyncpa [#allocation3], 1 }
 0x19e   :  { %125 = vsyncpa [#allocation4], 1 }

</bundles_post_ra>
